<compile_context>
chip_gen: v7x
topology: tpu7x:2x2x1
jax: 0.10.0
libtpu: 0.0.40
codegen_flags: <defaults>
</compile_context>

<pallas_src>
import numpy as np
import jax
import jax.numpy as jnp
from jax.experimental import pallas as pl
from jax.experimental.pallas import tpu as pltpu

EPS = 1e-5  # torch.nn.BatchNorm1d default


def _round_up(x, m):
    return (x + m - 1) // m * m


def nfm_kernel(emb_ref, lin_ref, w1t_ref, b1_ref, w2t_ref, b2_ref, w3_ref, out_ref):
    # ---- FactorizationMachine(reduce_sum=False), batch on lanes --------------------
    # emb_ref: (F, D, tb) bf16.  Accumulate per-field; cast each slab to f32 on load.
    F = emb_ref.shape[0]
    e0 = emb_ref[0].astype(jnp.float32)                 # (D, tb)
    s = e0
    sq = e0 * e0
    for f in range(1, F):                               # static, F is tiny (4)
        ef = emb_ref[f].astype(jnp.float32)
        s = s + ef
        sq = sq + ef * ef
    cross = 0.5 * (s * s - sq)                          # (D, tb)  (no transpose needed)

    # ---- MLP (BN0/BN1/BN2 already folded into w1t/b1, w2t/b2) ----------------------
    h = jnp.dot(w1t_ref[...], cross,
                preferred_element_type=jnp.float32) + b1_ref[...]   # (H1, tb)
    h = jnp.maximum(h, 0.0)
    h = jnp.dot(w2t_ref[...], h,
                preferred_element_type=jnp.float32) + b2_ref[...]   # (H2, tb)
    h = jnp.maximum(h, 0.0)

    # ---- MLP output layer (H2 -> 1): VPU multiply + sublane reduction --------------
    mlp = jnp.sum(h * w3_ref[...], axis=0, keepdims=True)           # (1, tb)

    # ---- FeaturesLinear (pre-summed, biases folded in) + lane-dense store ----------
    out_ref[...] = mlp + lin_ref[...]


def nfm_forward(x_idx, params, tile_b=1024):
    """x_idx: int32 (B, F) per-field indices; returns (B,) float32 (eval mode)."""
    B, F = x_idx.shape
    flat_idx = x_idx + params["offsets"][None, :]                    # (B, F)

    # Embedding / linear lookups (gather) as glue in plain JAX (see fusion TODO above).
    emb = params["emb_weight"][flat_idx]                             # (B, F, D) bf16
    lin_sum = params["lin_weight"][flat_idx][..., 0].astype(jnp.float32).sum(axis=1)
    # Fold FeaturesLinear bias + final MLP bias into the pre-summed linear term.
    lin_sum = lin_sum + (params["b3"][0] + params["lin_bias"][0]).astype(jnp.float32)

    D = emb.shape[-1]
    H1 = params["w1"].shape[1]
    H2 = params["w2"].shape[1]

    # ---- fold eval-mode BatchNorms into the Linear layers (tiny wrapper math) ------
    def bn_affine(bn):
        g, beta, mean, var = bn[0], bn[1], bn[2], bn[3]
        scale = g * jax.lax.rsqrt(var + EPS)
        return scale, beta - mean * scale

    s0, t0 = bn_affine(params["bn0"])
    s1, t1 = bn_affine(params["bn1"])
    s2, t2 = bn_affine(params["bn2"])

    w1 = params["w1"] * s0[:, None]                   # BN0 scale on inputs of W1
    b1 = params["b1"] + t0 @ params["w1"]             # BN0 shift absorbed into b1
    w1 = w1 * s1[None, :]                             # BN1 on outputs of W1
    b1 = b1 * s1 + t1
    w2 = params["w2"] * s2[None, :]                   # BN2 on outputs of W2
    b2 = params["b2"] * s2 + t2

    w1t = jnp.asarray(w1.T, jnp.float32)              # (H1, D)
    w2t = jnp.asarray(w2.T, jnp.float32)              # (H2, H1)
    w3 = params["w3"].astype(jnp.float32)             # (H2, 1)

    # ---- batch tiling: lane-dense, >= 2 grid steps when batch allows (v7x 2 TCs) ---
    B_pad128 = _round_up(B, 128)
    tb = max(128, min(_round_up(tile_b, 128), B_pad128))
    if B_pad128 // tb < 2 and B_pad128 >= 256:
        tb = max(128, _round_up(B_pad128 // 2, 128))
    B_pad = _round_up(B, tb)

    if B_pad != B:
        emb = jnp.pad(emb, ((0, B_pad - B), (0, 0), (0, 0)))
        lin_sum = jnp.pad(lin_sum, ((0, B_pad - B),))
    emb_t = jnp.transpose(emb, (1, 2, 0))             # (F, D, B_pad), batch on lanes
    lin_row = lin_sum.reshape(1, B_pad)               # (1, B_pad)

    resident = lambda i: (0, 0)
    out = pl.pallas_call(
        nfm_kernel,
        out_shape=jax.ShapeDtypeStruct((1, B_pad), jnp.float32),
        grid_spec=pltpu.PrefetchScalarGridSpec(
            num_scalar_prefetch=0,
            grid=(B_pad // tb,),
            in_specs=[
                pl.BlockSpec((F, D, tb), lambda i: (0, 0, i)),   # emb tile (lane-dense)
                pl.BlockSpec((1, tb), lambda i: (0, i)),         # pre-summed linear term
                pl.BlockSpec((H1, D), resident),                 # w1t (BN-folded)
                pl.BlockSpec((H1, 1), resident),                 # b1
                pl.BlockSpec((H2, H1), resident),                # w2t (BN-folded)
                pl.BlockSpec((H2, 1), resident),                 # b2
                pl.BlockSpec((H2, 1), resident),                 # w3
            ],
            out_specs=pl.BlockSpec((1, tb), lambda i: (0, i)),
        ),
        compiler_params=pltpu.CompilerParams(
            dimension_semantics=("parallel",),        # megacore on v7x
        ),
    )(emb_t, lin_row, w1t, b1.reshape(H1, 1), w2t, b2.reshape(H2, 1), w3)
    return out[0, :B]                                 # squeeze(1) + drop padding


def nfm_reference(x_idx, params):
    """Pure-JAX reference with the original (unfused) eval-mode math."""
    flat_idx = x_idx + params["offsets"][None, :]
    emb = params["emb_weight"][flat_idx].astype(jnp.float32)
    lin = params["lin_weight"][flat_idx][..., 0].astype(jnp.float32)

    def bn(x, p):
        g, b, m, v = p[0], p[1], p[2], p[3]
        return (x - m) / jnp.sqrt(v + EPS) * g + b

    s = emb.sum(1); sq = (emb * emb).sum(1)
    h = bn(0.5 * (s * s - sq), params["bn0"])
    h = jnp.maximum(bn(h @ params["w1"] + params["b1"], params["bn1"]), 0.0)
    h = jnp.maximum(bn(h @ params["w2"] + params["b2"], params["bn2"]), 0.0)
    mlp_out = h @ params["w3"] + params["b3"]
    lin_out = lin.sum(1, keepdims=True) + params["lin_bias"]
    return (mlp_out + lin_out)[:, 0]


def make_params(key, field_dims, dim, mlp_dims):
    ks = list(jax.random.split(key, 16))
    total = int(np.sum(field_dims))
    H1, H2 = mlp_dims

    def bn_block(k, c):
        k1, k2, k3, k4 = jax.random.split(k, 4)
        gamma = jax.random.uniform(k1, (c,), jnp.float32, 0.5, 1.5)
        beta = 0.1 * jax.random.normal(k2, (c,), jnp.float32)
        mean = 0.1 * jax.random.normal(k3, (c,), jnp.float32)
        var = jax.random.uniform(k4, (c,), jnp.float32, 0.5, 1.5)
        return jnp.stack([gamma, beta, mean, var], axis=0)  # (4, C)

    params = {
        "offsets": jnp.asarray(np.concatenate([[0], np.cumsum(field_dims)[:-1]]), jnp.int32),
        # bf16 storage for the (large) embedding table: halves gather/DMA bytes;
        # the kernel (and reference) cast to f32 for all compute.
        "emb_weight": (0.1 * jax.random.normal(ks[0], (total, dim), jnp.float32)
                       ).astype(jnp.bfloat16),
        "lin_weight": 0.1 * jax.random.normal(ks[1], (total, 1), jnp.float32),
        "lin_bias": jnp.zeros((1,), jnp.float32),
        "bn0": bn_block(ks[2], dim),
        "w1": 0.1 * jax.random.normal(ks[3], (dim, H1), jnp.float32),
        "b1": 0.1 * jax.random.normal(ks[4], (H1,), jnp.float32),
        "bn1": bn_block(ks[5], H1),
        "w2": 0.1 * jax.random.normal(ks[6], (H1, H2), jnp.float32),
        "b2": 0.1 * jax.random.normal(ks[7], (H2,), jnp.float32),
        "bn2": bn_block(ks[8], H2),
        "w3": 0.1 * jax.random.normal(ks[9], (H2, 1), jnp.float32),
        "b3": 0.1 * jax.random.normal(ks[10], (1,), jnp.float32),
    }
    return params


if __name__ == "__main__":
    key = jax.random.PRNGKey(0)
    field_dims = [10, 10, 10, 10]   # num_fields = 4
    dim = 16
    mlp_dims = (64, 32)
    B = 8

    kp, kx = jax.random.split(key)
    params = make_params(kp, field_dims, dim, mlp_dims)

    # x: Long tensor of size (batch_size, num_fields) with per-field indices.
    maxes = jnp.asarray(field_dims, jnp.int32)
    x = (jax.random.randint(kx, (B, len(field_dims)), 0, 10**6) % maxes[None, :]).astype(jnp.int32)

    out = nfm_forward(x, params)
    out = jax.block_until_ready(out)

    ref = nfm_reference(x, params)
    np.testing.assert_allclose(np.asarray(out), np.asarray(ref), rtol=2e-4, atol=2e-4)

    assert out.shape == (B,)
    print("KERNEL_OK")
</pallas_src>

<mosaic_0001>
module attributes {stable_mosaic.version = 11 : i64} {
  func.func @nfm_kernel(%arg0: i32, %arg1: memref<4x16x128xbf16, #tpu.memory_space<vmem>>, %arg2: memref<1x128xf32, #tpu.memory_space<vmem>>, %arg3: memref<64x16xf32, #tpu.memory_space<vmem>>, %arg4: memref<64x1xf32, #tpu.memory_space<vmem>>, %arg5: memref<32x64xf32, #tpu.memory_space<vmem>>, %arg6: memref<32x1xf32, #tpu.memory_space<vmem>>, %arg7: memref<32x1xf32, #tpu.memory_space<vmem>>, %arg8: memref<1x128xf32, #tpu.memory_space<vmem>>) attributes {dimension_semantics = [#tpu.dimension_semantics<parallel>], iteration_bounds = array<i64: 1>, scalar_prefetch = 0 : i64, scratch_operands = 0 : i64, tpu.core_type = #tpu.core_type<tc>, window_params = [{transform_indices = @transform_0, window_bounds = array<i64: 4, 16, 128>}, {transform_indices = @transform_1, window_bounds = array<i64: 1, 128>}, {pipeline_mode = #tpu.pipeline_mode<synchronous>, transform_indices = @transform_2, window_bounds = array<i64: 64, 16>}, {pipeline_mode = #tpu.pipeline_mode<synchronous>, transform_indices = @transform_3, window_bounds = array<i64: 64, 1>}, {pipeline_mode = #tpu.pipeline_mode<synchronous>, transform_indices = @transform_4, window_bounds = array<i64: 32, 64>}, {pipeline_mode = #tpu.pipeline_mode<synchronous>, transform_indices = @transform_5, window_bounds = array<i64: 32, 1>}, {pipeline_mode = #tpu.pipeline_mode<synchronous>, transform_indices = @transform_6, window_bounds = array<i64: 32, 1>}, {transform_indices = @transform_7, window_bounds = array<i64: 1, 128>}]} {
    %c0 = arith.constant 0 : index
    %c0_0 = arith.constant 0 : index
    %c0_1 = arith.constant 0 : index
    %0 = vector.load %arg1[%c0, %c0_0, %c0_1] : memref<4x16x128xbf16, #tpu.memory_space<vmem>>, vector<1x16x128xbf16>
    %1 = vector.shape_cast %0 : vector<1x16x128xbf16> to vector<16x128xbf16>
    %2 = arith.extf %1 : vector<16x128xbf16> to vector<16x128xf32>
    %3 = arith.mulf %2, %2 : vector<16x128xf32>
    %c1 = arith.constant 1 : index
    %c0_2 = arith.constant 0 : index
    %c0_3 = arith.constant 0 : index
    %4 = vector.load %arg1[%c1, %c0_2, %c0_3] : memref<4x16x128xbf16, #tpu.memory_space<vmem>>, vector<1x16x128xbf16>
    %5 = vector.shape_cast %4 : vector<1x16x128xbf16> to vector<16x128xbf16>
    %6 = arith.extf %5 : vector<16x128xbf16> to vector<16x128xf32>
    %7 = arith.addf %2, %6 : vector<16x128xf32>
    %8 = arith.mulf %6, %6 : vector<16x128xf32>
    %9 = arith.addf %3, %8 : vector<16x128xf32>
    %c2 = arith.constant 2 : index
    %c0_4 = arith.constant 0 : index
    %c0_5 = arith.constant 0 : index
    %10 = vector.load %arg1[%c2, %c0_4, %c0_5] : memref<4x16x128xbf16, #tpu.memory_space<vmem>>, vector<1x16x128xbf16>
    %11 = vector.shape_cast %10 : vector<1x16x128xbf16> to vector<16x128xbf16>
    %12 = arith.extf %11 : vector<16x128xbf16> to vector<16x128xf32>
    %13 = arith.addf %7, %12 : vector<16x128xf32>
    %14 = arith.mulf %12, %12 : vector<16x128xf32>
    %15 = arith.addf %9, %14 : vector<16x128xf32>
    %c3 = arith.constant 3 : index
    %c0_6 = arith.constant 0 : index
    %c0_7 = arith.constant 0 : index
    %16 = vector.load %arg1[%c3, %c0_6, %c0_7] : memref<4x16x128xbf16, #tpu.memory_space<vmem>>, vector<1x16x128xbf16>
    %17 = vector.shape_cast %16 : vector<1x16x128xbf16> to vector<16x128xbf16>
    %18 = arith.extf %17 : vector<16x128xbf16> to vector<16x128xf32>
    %19 = arith.addf %13, %18 : vector<16x128xf32>
    %20 = arith.mulf %18, %18 : vector<16x128xf32>
    %21 = arith.addf %15, %20 : vector<16x128xf32>
    %22 = arith.mulf %19, %19 : vector<16x128xf32>
    %23 = arith.subf %22, %21 : vector<16x128xf32>
    %cst = arith.constant 5.000000e-01 : f32
    %24 = vector.broadcast %cst : f32 to vector<16x128xf32>
    %25 = arith.mulf %24, %23 : vector<16x128xf32>
    %c0_8 = arith.constant 0 : index
    %c0_9 = arith.constant 0 : index
    %26 = vector.load %arg3[%c0_8, %c0_9] : memref<64x16xf32, #tpu.memory_space<vmem>>, vector<64x16xf32>
    %cst_10 = arith.constant dense<0.000000e+00> : vector<64x128xf32>
    %27 = tpu.matmul %26, %25, %cst_10 {dimension_numbers = #tpu.dot_dimension_numbers<[1], [0], [0], [1], [0, 0, 1, 1], [], []>} : vector<64x16xf32>, vector<16x128xf32>, vector<64x128xf32> -> vector<64x128xf32>
    %c0_11 = arith.constant 0 : index
    %c0_12 = arith.constant 0 : index
    %28 = vector.load %arg4[%c0_11, %c0_12] : memref<64x1xf32, #tpu.memory_space<vmem>>, vector<64x1xf32>
    %29 = vector.broadcast %28 : vector<64x1xf32> to vector<64x128xf32>
    %30 = arith.addf %27, %29 : vector<64x128xf32>
    %cst_13 = arith.constant 0.000000e+00 : f32
    %31 = vector.broadcast %cst_13 : f32 to vector<64x128xf32>
    %32 = arith.maximumf %30, %31 : vector<64x128xf32>
    %c0_14 = arith.constant 0 : index
    %c0_15 = arith.constant 0 : index
    %33 = vector.load %arg5[%c0_14, %c0_15] : memref<32x64xf32, #tpu.memory_space<vmem>>, vector<32x64xf32>
    %cst_16 = arith.constant dense<0.000000e+00> : vector<32x128xf32>
    %34 = tpu.matmul %33, %32, %cst_16 {dimension_numbers = #tpu.dot_dimension_numbers<[1], [0], [0], [1], [0, 0, 1, 1], [], []>} : vector<32x64xf32>, vector<64x128xf32>, vector<32x128xf32> -> vector<32x128xf32>
    %c0_17 = arith.constant 0 : index
    %c0_18 = arith.constant 0 : index
    %35 = vector.load %arg6[%c0_17, %c0_18] : memref<32x1xf32, #tpu.memory_space<vmem>>, vector<32x1xf32>
    %36 = vector.broadcast %35 : vector<32x1xf32> to vector<32x128xf32>
    %37 = arith.addf %34, %36 : vector<32x128xf32>
    %cst_19 = arith.constant 0.000000e+00 : f32
    %38 = vector.broadcast %cst_19 : f32 to vector<32x128xf32>
    %39 = arith.maximumf %37, %38 : vector<32x128xf32>
    %c0_20 = arith.constant 0 : index
    %c0_21 = arith.constant 0 : index
    %40 = vector.load %arg7[%c0_20, %c0_21] : memref<32x1xf32, #tpu.memory_space<vmem>>, vector<32x1xf32>
    %41 = vector.broadcast %40 : vector<32x1xf32> to vector<32x128xf32>
    %42 = arith.mulf %39, %41 : vector<32x128xf32>
    %cst_22 = arith.constant dense<0.000000e+00> : vector<128xf32>
    %43 = vector.multi_reduction <add>, %42, %cst_22 [0] : vector<32x128xf32> to vector<128xf32>
    %44 = vector.shape_cast %43 : vector<128xf32> to vector<1x128xf32>
    %c0_23 = arith.constant 0 : index
    %c0_24 = arith.constant 0 : index
    %45 = vector.load %arg2[%c0_23, %c0_24] : memref<1x128xf32, #tpu.memory_space<vmem>>, vector<1x128xf32>
    %46 = arith.addf %44, %45 : vector<1x128xf32>
    %c0_25 = arith.constant 0 : index
    %c0_26 = arith.constant 0 : index
    %47 = vector.load %arg8[%c0_25, %c0_26] : memref<1x128xf32, #tpu.memory_space<vmem>>, vector<1x128xf32>
    tpu.vector_store %arg8[%c0_25, %c0_26], %46 {strides = array<i32>} : memref<1x128xf32, #tpu.memory_space<vmem>>, vector<1x128xf32>,
    return
  }
  func.func @transform_0(%arg0: i32) -> (i32, i32, i32) {
    %c0_i32 = arith.constant 0 : i32
    %c0_i32_0 = arith.constant 0 : i32
    %c0_i32_1 = arith.constant 0 : i32
    return %c0_i32, %c0_i32_0, %arg0 : i32, i32, i32
  }
  func.func @transform_1(%arg0: i32) -> (i32, i32) {
    %c0_i32 = arith.constant 0 : i32
    %c0_i32_0 = arith.constant 0 : i32
    return %c0_i32, %arg0 : i32, i32
  }
  func.func @transform_2(%arg0: i32) -> (i32, i32) {
    %c0_i32 = arith.constant 0 : i32
    %c0_i32_0 = arith.constant 0 : i32
    %c0_i32_1 = arith.constant 0 : i32
    return %c0_i32, %c0_i32_0 : i32, i32
  }
  func.func @transform_3(%arg0: i32) -> (i32, i32) {
    %c0_i32 = arith.constant 0 : i32
    %c0_i32_0 = arith.constant 0 : i32
    %c0_i32_1 = arith.constant 0 : i32
    return %c0_i32, %c0_i32_0 : i32, i32
  }
  func.func @transform_4(%arg0: i32) -> (i32, i32) {
    %c0_i32 = arith.constant 0 : i32
    %c0_i32_0 = arith.constant 0 : i32
    %c0_i32_1 = arith.constant 0 : i32
    return %c0_i32, %c0_i32_0 : i32, i32
  }
  func.func @transform_5(%arg0: i32) -> (i32, i32) {
    %c0_i32 = arith.constant 0 : i32
    %c0_i32_0 = arith.constant 0 : i32
    %c0_i32_1 = arith.constant 0 : i32
    return %c0_i32, %c0_i32_0 : i32, i32
  }
  func.func @transform_6(%arg0: i32) -> (i32, i32) {
    %c0_i32 = arith.constant 0 : i32
    %c0_i32_0 = arith.constant 0 : i32
    %c0_i32_1 = arith.constant 0 : i32
    return %c0_i32, %c0_i32_0 : i32, i32
  }
  func.func @transform_7(%arg0: i32) -> (i32, i32) {
    %c0_i32 = arith.constant 0 : i32
    %c0_i32_0 = arith.constant 0 : i32
    return %c0_i32, %arg0 : i32, i32
  }
}

</mosaic_0001>

<bundles_post_ra>
// kernel: tpu_custom_call.1
= control target key start
LH: loop header
LB: loop body
LE: loop exit
PB: predicated region body
PF: predicated region fallthrough
CT: control target
= control target key end

     0   :  { %vm128_vm0 = vcmask 130048   ;;  %v615_v9 = vmov 0   ;;  %s781_s0 = inlined_call_operand.vmem [shape: bf16[4,16,128], index: 0, kind: input, shape index: {}]   ;;  %s782_s1 = inlined_call_operand.vmem [shape: f32[1,128], index: 1, kind: input, shape index: {}]   ;;  %s783_s2 = inlined_call_operand.vmem [shape: f32[64,16], index: 2, kind: input, shape index: {}]   ;;  %s784_s3 = inlined_call_operand.vmem [shape: f32[64,1], index: 3, kind: input, shape index: {}]   ;;  %s785_s4 = inlined_call_operand.vmem [shape: f32[32,64], index: 4, kind: input, shape index: {}]   ;;  %s786_s5 = inlined_call_operand.vmem [shape: f32[32,1], index: 5, kind: input, shape index: {}]   ;;  %s787_s6 = inlined_call_operand.vmem [shape: f32[32,1], index: 6, kind: input, shape index: {}]   ;;  %s788_s7 = inlined_call_operand.hbm [shape: f32[1,128], index: 7, kind: output, shape index: {}]  }
   0x1   :  { %v469_v0 = vld [vmem:[%s781_s0] sm:$0xff]   ;;  %v484_v1 = vld [vmem:[%s781_s0 + $0x8] sm:$0xff]   ;;  %v485_v2 = vld [vmem:[%s781_s0 + $0x10] sm:$0xff]   ;;  %569 = vset.pattern.permute.xlu0 %v615_v9  ;;  %570 = vset.pattern.permute.xlu1 %v615_v9 }
   0x2   :  { %v470_v3 = vunpack.c.l.bf16 %v469_v0  ;;  %v471_v4 = vunpack.c.h.bf16 %v469_v0  ;;  %v474_v5 = vunpack.c.l.bf16 %v484_v1  ;;  %v475_v6 = vunpack.c.h.bf16 %v484_v1  ;;  %v486_v7 = vld [vmem:[%s781_s0 + $0x18] sm:$0xff]   ;;  %v72_v8 = vld [vmem:[%s783_s2] sm:$0xff]  ;;  %v82_v17 = vld [vmem:[%s784_s3 + $0x10] sm:$0xff] }
   0x3   :  { %v478_v10 = vunpack.c.l.bf16 %v485_v2  ;;  %v479_v11 = vunpack.c.h.bf16 %v485_v2  ;;  %v482_v12 = vunpack.c.l.bf16 %v486_v7  ;;  %v483_v13 = vunpack.c.h.bf16 %v486_v7  ;;  %513 = vmatprep.mubr.msk.f32.mxu0 %vm128_vm0, %v72_v8  ;;  %v80_v16 = vld [vmem:[%s784_s3] sm:$0xff]  ;;  %100 = vperm.xlu1 %570, %v82_v17   ;;  %v81_v20 = vld [vmem:[%s784_s3 + $0x8] sm:$0xff]  ;;  %v83_v23 = vld [vmem:[%s784_s3 + $0x18] sm:$0xff] }
   0x4   :  { %v38_v14 = vadd.f32 %v474_v5, %v470_v3  ;;  %v39_v15 = vadd.f32 %v475_v6, %v471_v4  ;;  %90 = vperm.xlu0 %569, %v80_v16   ;;  %595 = vmul.bf16.f32.vacc0 %v469_v0, %v469_v0 }
   0x5   :  { %596 = vmac.bf16.f32.vacc0 %v484_v1, %v484_v1 }
   0x6   :  { %v49_v18 = vadd.f32 %v478_v10, %v38_v14  ;;  %v50_v19 = vadd.f32 %v479_v11, %v39_v15  ;;  %597 = vmac.bf16.f32.vacc0 %v485_v2, %v485_v2 }
   0x8   :  { %v60_v21 = vadd.f32 %v482_v12, %v49_v18  ;;  %v61_v22 = vadd.f32 %v483_v13, %v50_v19  ;;  %95 = vperm.xlu0 %569, %v81_v20  }
   0xa   :  { %v66_v24 = vmul.f32 %v60_v21, %v60_v21  ;;  %v67_v25 = vmul.f32 %v61_v22, %v61_v22 }
   0xb   :  { %12 = vsyncpa [#allocation3], 0  ;;  %598 = vmac.bf16.f32.vacc0 %v486_v7, %v486_v7  ;;  %v616_v30 = vmov 1935823168   ;;  %v605_v33 = vlaneseq  ;;  %105 = vperm.xlu1 %570, %v83_v23   ;;  %v84_v38 = vld [vmem:[%s784_s3 + $0x20] sm:$0xff]  ;;  %v85_v39 = vld [vmem:[%s784_s3 + $0x28] sm:$0xff] }
   0xc   :  { %v603_v31 = vunpack.c.l.s4 %v616_v30  ;;  %110 = vperm.xlu0 %569, %v84_v38   ;;  %v86_v44 = vld [vmem:[%s784_s3 + $0x30] sm:$0xff]  ;;  %v87_v45 = vld [vmem:[%s784_s3 + $0x38] sm:$0xff]  ;;  %v270_v47 = vld [vmem:[%s786_s5] sm:$0xff]  ;;  %vm294_vm1 = vcmask 523264   ;;  %s617_s0 = smov [#allocation2]  }
   0xd   :  { %v599_v26 = vmovacc.add.low.vacc0  ;;  %v606_v34 = vshrl.u32 %v605_v33, 7  ;;  %v73_v48 = vld [vmem:[%s783_s2 + $0x8] sm:$0xff]  ;;  %v74_v50 = vld [vmem:[%s783_s2 + $0x10] sm:$0xff]  ;;  %v75_v52 = vld [vmem:[%s783_s2 + $0x18] sm:$0xff]  ;;  %s442_s13 = sshll.u32 %s617_s0, 4  ;;  %s443_s13 = int_to_ptr.vmem [resolvable:$true] %s442_s13 }
   0xe   :  { %v600_v27 = vmovacc.add.high.vacc0  ;;  %v604_v32 = vunpack.c.0.s8 %v603_v31  ;;  %v271_v49 = vld [vmem:[%s786_s5 + $0x8] sm:$0xff]  ;;  %v272_v51 = vld [vmem:[%s786_s5 + $0x10] sm:$0xff]  ;;  %v273_v53 = vld [vmem:[%s786_s5 + $0x18] sm:$0xff]  ;;  %s571_s14 = scalar_lea.vmem %s443_s13, 16  ;;  %s575_s15 = scalar_lea.vmem %s443_s13, 32 }
   0xf   :  { %115 = vperm.xlu1 %570, %v85_v39   ;;  %v76_v54 = vld [vmem:[%s783_s2 + $0x20] sm:$0xff]  ;;  %v77_v56 = vld [vmem:[%s783_s2 + $0x28] sm:$0xff]  ;;  %v78_v58 = vld [vmem:[%s783_s2 + $0x30] sm:$0xff]  ;;  %p572_p0 = scmp.ne.s32.totalorder %s443_s13, %s571_s14  ;;  %p576_p1 = scmp.lt.s32.totalorder %s443_s13, %s443_s13 }
  0x10   :  { %v601_v28 = vcombine.low %v599_v26, %v600_v27  ;;  %v602_v29 = vcombine.high %v599_v26, %v600_v27  ;;  %v607_v35 = vsub.s32 %v604_v32, %v606_v34  ;;  %120 = vperm.xlu0 %569, %v86_v44   ;;  %v396_v55 = vld [vmem:[%s787_s6] sm:$0xff]  ;;  %v397_v57 = vld [vmem:[%s787_s6 + $0x8] sm:$0xff]  ;;  %v398_v59 = vld [vmem:[%s787_s6 + $0x10] sm:$0xff]  ;;  %p577_p2 = scmp.lt.s32.totalorder %s575_s15, %s571_s14 }
  0x11   :  { %v79_v60 = vld [vmem:[%s783_s2 + $0x38] sm:$0xff]  ;;  %v266_v62 = vld [vmem:[%s785_s4] sm:$0xff] }
  0x12   :  { %v608_v36 = vrot.slane %v601_v28, %v607_v35  ;;  %v614_v37 = vrot.slane %v602_v29, %v607_v35  ;;  %v399_v61 = vld [vmem:[%s787_s6 + $0x18] sm:$0xff]  ;;  %541 = vmatprep.mubr.msk.f32.mxu1 %vm294_vm1, %v266_v62  ;;  %v267_v35 = vld [vmem:[%s785_s4 + $0x8] sm:$0xff]  ;;  %p578_p3 = por %p577_p2, %p576_p1 }
  0x13   :  { %125 = vperm.xlu1 %570, %v87_v45  }
  0x14   :  { %v68_v40 = vsub.f32 %v66_v24, %v608_v36  ;;  %v69_v41 = vsub.f32 %v67_v25, %v614_v37  ;;  %276 = vperm.xlu0 %569, %v270_v47   ;;  %v268_v36 = vld [vmem:[%s785_s4 + $0x10] sm:$0xff]  ;;  %v269_v37 = vld [vmem:[%s785_s4 + $0x18] sm:$0xff]  ;;  %p579_p4 = pnand %p578_p3, %p572_p0 }
  0x16   :  { %v70_v42 = vmul.f32 0.5, %v68_v40  ;;  %v71_v43 = vmul.f32 0.5, %v69_v41 }
  0x17   :  { %281 = vperm.xlu1 %570, %v271_v49  }
  0x18   :  { %v547_v46 = vpack.c.bf16 %v71_v43, %v70_v42  ;;  %286 = vperm.xlu0 %569, %v272_v51  }
  0x1a   :  { %548 = vmatprep.subr.bf16.mxu0 %v547_v46 }
  0x1b   :  { %550 = vmatpush3.bf16.msra.mxu0 %v547_v46  ;;  %291 = vperm.xlu1 %570, %v273_v53  }
  0x1c   :  { %402 = vperm.xlu0 %569, %v396_v55  }
  0x1e   :  { %514 = vmatmul.mubr.msk.f32.vlgmr.msra.gmra.mrb[0].mxu0 %vm128_vm0, %v73_v48 }
  0x1f   :  { %516 = vmatprep.mubr.msk.f32.mxu0 %vm128_vm0, %v74_v50  ;;  %407 = vperm.xlu1 %570, %v397_v57  }
  0x20   :  { %412 = vperm.xlu0 %569, %v398_v59  }
  0x22   :  { %517 = vmatmul.mubr.msk.f32.gmra.mrb[2].mxu0 %vm128_vm0, %v75_v52 }
  0x23   :  { %519 = vmatprep.mubr.msk.f32.mxu0 %vm128_vm0, %v76_v54  ;;  %417 = vperm.xlu1 %570, %v399_v61  }
  0x26   :  { %520 = vmatmul.mubr.msk.f32.gmra.mrb[4].mxu0 %vm128_vm0, %v77_v56 }
  0x27   :  { %522 = vmatprep.mubr.msk.f32.mxu0 %vm128_vm0, %v78_v58 }
  0x2a   :  { %523 = vmatmul.mubr.msk.f32.gmra.mrb[6].mxu0 %vm128_vm0, %v79_v60 }
  0x82   :  { %v101_v0 = vpop.permute.xlu1 %100 }
  0x83   :  { %v91_v63 = vpop.permute.xlu0 %90 }
  0x87   :  { %v96_v1 = vpop.permute.xlu0 %95 }
  0x8a   :  { %v106_v2 = vpop.permute.xlu1 %105 }
  0x8b   :  { %v111_v15 = vpop.permute.xlu0 %110 }
  0x8e   :  { %v116_v12 = vpop.permute.xlu1 %115 }
  0x8f   :  { %v121_v27 = vpop.permute.xlu0 %120 }
  0x92   :  { %v126_v24 = vpop.permute.xlu1 %125 }
  0x93   :  { %v277_v38 = vpop.permute.xlu0 %276 }
  0x96   :  { %v282_v39 = vpop.permute.xlu1 %281 }
  0x97   :  { %v287_v40 = vpop.permute.xlu0 %286 }
  0x9a   :  { %v292_v41 = vpop.permute.xlu1 %291 }
  0x9b   :  { %v403_v46 = vpop.permute.xlu0 %402 }
  0x9e   :  { %v408_v48 = vpop.permute.xlu1 %407 }
  0x9f   :  { %v413_v59 = vpop.permute.xlu0 %412 }
  0xa2   :  { %v418_v61 = vpop.permute.xlu1 %417 }
  0xf1   :  { %v515_v3 = vpop.f32.mrb[0].mxu0 }
  0xf2   :  { %v225_v4 = vadd.f32 %v515_v3, %v96_v1  ;;  %v219_v5 = vpop.f32.mrb[1].mxu0 }
  0xf3   :  { %v220_v6 = vadd.f32 %v219_v5, %v91_v63 }
  0xf4   :  { %v259_v7 = vmax.f32 %v225_v4, 0.0 }
  0xf5   :  { %v258_v8 = vmax.f32 %v220_v6, 0.0  ;;  %v518_v9 = vpop.f32.mrb[2].mxu0  ;;  %v433_v6 = vld [vmem:[%s782_s1] sm:$0x1] }
  0xf6   :  { %v235_v10 = vadd.f32 %v518_v9, %v106_v2  ;;  %v229_v11 = vpop.f32.mrb[3].mxu0 }
  0xf7   :  { %v230_v13 = vadd.f32 %v229_v11, %v101_v0  ;;  %v551_v14 = vpack.c.bf16 %v259_v7, %v258_v8 }
  0xf8   :  { %v261_v16 = vmax.f32 %v235_v10, 0.0 }
  0xf9   :  { %v260_v17 = vmax.f32 %v230_v13, 0.0  ;;  %v521_v18 = vpop.f32.mrb[4].mxu0  ;;  %552 = vmatprep.subr.bf16.mxu1 %v551_v14 }
  0xfa   :  { %v245_v19 = vadd.f32 %v521_v18, %v116_v12  ;;  %v239_v20 = vpop.f32.mrb[5].mxu0  ;;  %554 = vmatpush3.bf16.msra.mxu1 %v551_v14 }
  0xfb   :  { %v555_v21 = vpack.c.bf16 %v261_v16, %v260_v17  ;;  %v240_v22 = vadd.f32 %v239_v20, %v111_v15 }
  0xfc   :  { %v263_v23 = vmax.f32 %v245_v19, 0.0 }
  0xfd   :  { %v262_v25 = vmax.f32 %v240_v22, 0.0  ;;  %v524_v26 = vpop.f32.mrb[6].mxu0  ;;  %556 = vmatprep.subr.bf16.mxu1 %v555_v21 }
  0xfe   :  { %v255_v28 = vadd.f32 %v524_v26, %v126_v24  ;;  %v249_v29 = vpop.f32.mrb[7].mxu0  ;;  %558 = vmatpush3.bf16.msra.mxu1 %v555_v21 }
  0xff   :  { %v559_v30 = vpack.c.bf16 %v263_v23, %v262_v25  ;;  %v250_v31 = vadd.f32 %v249_v29, %v121_v27 }
 0x100   :  { %v265_v32 = vmax.f32 %v255_v28, 0.0 }
 0x101   :  { %v264_v33 = vmax.f32 %v250_v31, 0.0  ;;  %560 = vmatprep.subr.bf16.mxu1 %v559_v30 }
 0x102   :  { %562 = vmatpush3.bf16.msra.mxu1 %v559_v30 }
 0x103   :  { %v563_v34 = vpack.c.bf16 %v265_v32, %v264_v33 }
 0x105   :  { %564 = vmatprep.subr.bf16.mxu1 %v563_v34 }
 0x106   :  { %566 = vmatpush3.bf16.msra.mxu1 %v563_v34 }
 0x109   :  { %542 = vmatmul.mubr.msk.f32.vlgmr.msra.gmra.mrb[0].mxu1 %vm294_vm1, %v267_v35 }
 0x10a   :  { %544 = vmatprep.mubr.msk.f32.mxu1 %vm294_vm1, %v268_v36 }
 0x10d   :  { %545 = vmatmul.mubr.msk.f32.gmra.mrb[2].mxu1 %vm294_vm1, %v269_v37 }
 0x1dc   :  { %v543_v42 = vpop.f32.mrb[0].mxu1 }
 0x1dd   :  { %v379_v43 = vadd.f32 %v543_v42, %v282_v39  ;;  %v373_v44 = vpop.f32.mrb[1].mxu1 }
 0x1de   :  { %v374_v45 = vadd.f32 %v373_v44, %v277_v38 }
 0x1df   :  { %v393_v47 = vmax.f32 %v379_v43, 0.0 }
 0x1e0   :  { %v392_v49 = vmax.f32 %v374_v45, 0.0  ;;  %v546_v50 = vpop.f32.mrb[2].mxu1 }
 0x1e1   :  { %v421_v51 = vmul.f32 %v408_v48, %v393_v47  ;;  %v389_v52 = vadd.f32 %v546_v50, %v292_v41  ;;  %v383_v53 = vpop.f32.mrb[3].mxu1 }
 0x1e2   :  { %v420_v54 = vmul.f32 %v403_v46, %v392_v49  ;;  %v384_v55 = vadd.f32 %v383_v53, %v287_v40 }
 0x1e3   :  { %v395_v57 = vmax.f32 %v389_v52, 0.0 }
 0x1e4   :  { %v424_v56 = vadd.f32 %v421_v51, %v420_v54  ;;  %v394_v58 = vmax.f32 %v384_v55, 0.0 }
 0x1e5   :  { %v423_v62 = vmul.f32 %v418_v61, %v395_v57 }
 0x1e6   :  { %v422_v60 = vmul.f32 %v413_v59, %v394_v58 }
 0x1e8   :  { %v425_v63 = vadd.f32 %v424_v56, %v422_v60 }
 0x1ea   :  { %v426_v0 = vadd.f32 %v425_v63, %v423_v62 }
 0x1ec   :  { %v427_v1 = vrot.slane %v426_v0, 4 }
 0x1ee   :  { %v428_v2 = vadd.f32 %v427_v1, %v426_v0 }
 0x1f0   :  { %v429_v3 = vrot.slane %v428_v2, 2 }
 0x1f2   :  { %v430_v4 = vadd.f32 %v429_v3, %v428_v2 }
 0x1f4   :  { %v431_v5 = vrot.slane %v430_v4, 1 }
 0x1f6   :  { %v432_v7 = vadd.f32 %v431_v5, %v430_v4 }
 0x1f8   :  { %v434_v8 = vadd.f32 %v433_v6, %v432_v7 }
 0x1fa   :  { %435 = vst [vmem:[#allocation2] sm:$0x1] %v434_v8 }
 0x1fb   :  { %582 = shalt.err (!%p579_p4)
}
 0x1fc   :  { %s583_s18 = scalar_lea.hbm %s788_s7, 16 }
 0x1fd   :  { %p584_p5 = scmp.ne.s32.totalorder %s788_s7, %s583_s18  ;;  %p587_p6 = scmp.lt.u32.totalorder %s583_s18, %s788_s7 }
 0x1ff   :  { %p589_p7 = pnand %p587_p6, %p584_p5 }
 0x201   :  { %592 = shalt.err (!%p589_p7)
}
 0x202   :  { %445 = dma.vmem_to_hbm [thread:$0]  %s443_s13, 16, %s788_s7, [#allocation3]  }
 0x203   :  { %593 = dma.done.wait [#allocation3], 16  }
 0x204   :  { %594 = vsyncadd [#allocation3], 4294967280 }
 0x205   :  { %449 = vsyncpa [#allocation3], 1 }

</bundles_post_ra>
